<compile_context>
chip_gen: v6e
topology: v6e:2x2x1
jax: 0.10.0
libtpu: 0.0.40
codegen_flags: <defaults>
</compile_context>

<pallas_src>
import math
import functools

import jax
import jax.numpy as jnp
from jax import lax
from jax.experimental import pallas as pl
from jax.experimental.pallas import tpu as pltpu


# --------------------------------------------------------------------------
# Kernel 1: LayerNorm + fused Q/K/V projection (single pass over rows).
# Grid = (batch, row-tile, weight-column-tile).
# --------------------------------------------------------------------------
def _qkv_proj_kernel(x_ref, gamma_ref, beta_ref,
                     wq_ref, bq_ref, wk_ref, bk_ref, wv_ref, bv_ref,
                     q_ref, k_ref, v_ref, xn_sc, *, scale):
    n = pl.program_id(2)

    # LayerNorm of the full row computed once per row tile, cached in VMEM.
    @pl.when(n == 0)
    def _():
        x = x_ref[0].astype(jnp.float32)                       # (tr, D)
        mean = jnp.mean(x, axis=-1, keepdims=True)
        var = jnp.mean((x - mean) ** 2, axis=-1, keepdims=True)
        xn = (x - mean) * lax.rsqrt(var + 1e-5)
        xn = xn * gamma_ref[...] + beta_ref[...]
        xn_sc[...] = xn.astype(jnp.bfloat16)

    xn = xn_sc[...]                                            # (tr, D) bf16
    # bf16 operands, f32 accumulation; 1/sqrt(d_k) folded into Q here.
    q_ref[0] = ((jnp.dot(xn, wq_ref[...], preferred_element_type=jnp.float32)
                 + bq_ref[...]) * scale).astype(jnp.bfloat16)
    k_ref[0] = (jnp.dot(xn, wk_ref[...], preferred_element_type=jnp.float32)
                + bk_ref[...]).astype(jnp.bfloat16)
    v_ref[0] = (jnp.dot(xn, wv_ref[...], preferred_element_type=jnp.float32)
                + bv_ref[...]).astype(jnp.bfloat16)


# --------------------------------------------------------------------------
# Kernel 2: flash-style attention + output projection + residual.
# Grid = (batch, query-tile, kv-tile); kv-tile is the online-softmax reduction.
# --------------------------------------------------------------------------
def _flash_attn_kernel(q_ref, k_ref, v_ref, xres_ref, wo_ref, bo_ref,
                       o_ref, m_sc, l_sc, acc_sc, *, n_heads, d_k):
    kv = pl.program_id(2)

    @pl.when(kv == 0)
    def _():
        m_sc[...] = jnp.full_like(m_sc, -jnp.inf)
        l_sc[...] = jnp.zeros_like(l_sc)
        acc_sc[...] = jnp.zeros_like(acc_sc)

    q = q_ref[0]                          # (tq, D) bf16, pre-scaled
    k = k_ref[0]                          # (tkv, D) bf16
    v = v_ref[0]                          # (tkv, D) bf16

    for h in range(n_heads):              # static unroll (small head counts)
        sl = slice(h * d_k, (h + 1) * d_k)
        # (tq, tkv): contract last dims of q_h and k_h -- no explicit K^T tile.
        s = lax.dot_general(q[:, sl], k[:, sl],
                            (((1,), (1,)), ((), ())),
                            preferred_element_type=jnp.float32)
        m_prev = m_sc[h]                                       # (tq, 1)
        m_new = jnp.maximum(m_prev, jnp.max(s, axis=-1, keepdims=True))
        alpha = jnp.exp(m_prev - m_new)
        p = jnp.exp(s - m_new)                                 # (tq, tkv)
        l_sc[h] = alpha * l_sc[h] + jnp.sum(p, axis=-1, keepdims=True)
        acc_sc[:, sl] = alpha * acc_sc[:, sl] + jnp.dot(
            p.astype(jnp.bfloat16), v[:, sl],
            preferred_element_type=jnp.float32)
        m_sc[h] = m_new

    # Finalize: per-head normalize in place, then ONE lane-dense Wo matmul,
    # bias and residual (original pre-LayerNorm query rows) added on top.
    @pl.when(kv == pl.num_programs(2) - 1)
    def _():
        for h in range(n_heads):
            sl = slice(h * d_k, (h + 1) * d_k)
            acc_sc[:, sl] = acc_sc[:, sl] * pl.reciprocal(l_sc[h], approx=True)
        ctx = acc_sc[...].astype(jnp.bfloat16)                 # (tq, D)
        out = jnp.dot(ctx, wo_ref[...], preferred_element_type=jnp.float32)
        o_ref[0] = (out + bo_ref[...]
                    + xres_ref[0].astype(jnp.float32)).astype(o_ref.dtype)


# --------------------------------------------------------------------------
# Wrapper / tiling helpers
# --------------------------------------------------------------------------
def _pick_tile(s, cap, step=8):
    """Largest multiple-of-`step` divisor of s that is <= cap (or s itself)."""
    if s <= cap:
        return s
    t = (cap // step) * step
    while t >= step:
        if s % t == 0:
            return t
        t -= step
    return s


def _tq_cap():
    # v5e: smaller (TQ, TKV) score tiles spill less against its single vst slot.
    try:
        kind = jax.devices()[0].device_kind.lower()
        if "v5e" in kind or "v5 lite" in kind or "v5lite" in kind:
            return 128
    except Exception:
        pass
    return 256


def _vmem_capacity_bytes():
    try:
        return int(pltpu.get_tpu_info().vmem_capacity_bytes)
    except Exception:
        return 64 * 1024 * 1024          # conservative: v7x per-TC physical


def _vmem_limit(estimate):
    cap = _vmem_capacity_bytes()
    return int(min(cap - 8 * 1024 * 1024,
                   max(32 * 1024 * 1024, 2 * estimate)))


def _bf16(a):
    return a if a.dtype == jnp.bfloat16 else a.astype(jnp.bfloat16)


def prepare_params(params):
    """One-time bf16 cast of the projection weights (do NOT redo per call)."""
    out = dict(params)
    for k in ("wq", "wk", "wv", "wo"):
        out[k] = _bf16(params[k])
    return out


def attention_qkv(x, params, *, n_heads, tq=None, tkv=None):
    """Pallas implementation of AttentionQKV.forward (mask=None, eval mode)."""
    squeeze = (x.ndim == 2)
    if squeeze:
        x = x[:, None, :]                                      # (B, 1, D)
    B, S, D = x.shape
    assert D % n_heads == 0
    assert n_heads > 1  # TODO(synk): h==1 no-projection fast path not implemented
    d_k = D // n_heads

    tq = _pick_tile(S, _tq_cap()) if tq is None else tq
    tkv = _pick_tile(S, 256) if tkv is None else tkv
    assert S % tq == 0 and S % tkv == 0
    nq, nkv = S // tq, S // tkv

    wq, wk, wv, wo = (_bf16(params[k]) for k in ("wq", "wk", "wv", "wo"))

    # ---------------- pass 1: LayerNorm + QKV projection ----------------
    tr = _pick_tile(S, 256)                  # row tile for the projection pass
    tn = _pick_tile(D, 512, step=128)        # weight output-column tile
    nr, nn = S // tr, D // tn

    const2d = lambda b, i, n: (0, 0)
    x_spec = pl.BlockSpec((1, tr, D), lambda b, i, n: (b, i, 0))
    ln_spec = pl.BlockSpec((1, D), const2d, pipeline_mode=pl.Buffered(1))
    w_spec = pl.BlockSpec((D, tn), lambda b, i, n: (0, n))
    wb_spec = pl.BlockSpec((1, tn), lambda b, i, n: (0, n))
    qkv_out = pl.BlockSpec((1, tr, tn), lambda b, i, n: (b, i, n))

    proj_est = (2 * tr * D * x.dtype.itemsize      # x (resident)
                + 2 * D * 4                        # gamma/beta
                + 3 * 2 * D * tn * 2               # Wq/Wk/Wv double-buffered
                + 3 * 2 * tn * 4                   # biases
                + 3 * 2 * tr * tn * 2              # q/k/v out tiles
                + tr * D * 2)                      # xn scratch

    q, k, v = pl.pallas_call(
        functools.partial(_qkv_proj_kernel, scale=1.0 / math.sqrt(d_k)),
        out_shape=(jax.ShapeDtypeStruct((B, S, D), jnp.bfloat16),
                   jax.ShapeDtypeStruct((B, S, D), jnp.bfloat16),
                   jax.ShapeDtypeStruct((B, S, D), jnp.bfloat16)),
        grid_spec=pltpu.PrefetchScalarGridSpec(
            num_scalar_prefetch=0,
            grid=(B, nr, nn),
            in_specs=[x_spec, ln_spec, ln_spec,
                      w_spec, wb_spec, w_spec, wb_spec, w_spec, wb_spec],
            out_specs=[qkv_out, qkv_out, qkv_out],
            scratch_shapes=[pltpu.VMEM((tr, D), jnp.bfloat16)]),
        compiler_params=pltpu.CompilerParams(
            dimension_semantics=("parallel", "parallel", "arbitrary"),
            vmem_limit_bytes=_vmem_limit(proj_est)),
    )(x, params["gamma"], params["beta"],
      wq, params["bq"], wk, params["bk"], wv, params["bv"])

    # ---------------- pass 2: flash attention + Wo + residual ----------------
    kv_depth = min(3, max(2, nkv))           # deeper KV pipeline when it helps
    q_spec = pl.BlockSpec((1, tq, D), lambda b, i, j: (b, i, 0))
    kv_spec = pl.BlockSpec((1, tkv, D), lambda b, i, j: (b, j, 0),
                           pipeline_mode=pl.Buffered(kv_depth))
    xres_spec = pl.BlockSpec((1, tq, D), lambda b, i, j: (b, i, 0))
    wo_spec = pl.BlockSpec((D, D), lambda b, i, j: (0, 0),
                           pipeline_mode=pl.Buffered(1))
    bo_spec = pl.BlockSpec((1, D), lambda b, i, j: (0, 0),
                           pipeline_mode=pl.Buffered(1))

    attn_est = (2 * tq * D * 2                       # q
                + 2 * kv_depth * tkv * D * 2         # k + v
                + 2 * tq * D * x.dtype.itemsize      # residual rows
                + D * D * 2 + D * 4                  # Wo + bo (resident)
                + 2 * tq * D * x.dtype.itemsize      # output tiles
                + 2 * n_heads * tq * 4 + tq * D * 4  # m/l/acc scratch
                + 4 * tq * tkv * 4)                  # transient score/p headroom

    out = pl.pallas_call(
        functools.partial(_flash_attn_kernel, n_heads=n_heads, d_k=d_k),
        out_shape=jax.ShapeDtypeStruct((B, S, D), x.dtype),
        grid_spec=pltpu.PrefetchScalarGridSpec(
            num_scalar_prefetch=0,
            grid=(B, nq, nkv),
            in_specs=[q_spec, kv_spec, kv_spec, xres_spec, wo_spec, bo_spec],
            out_specs=pl.BlockSpec((1, tq, D), lambda b, i, j: (b, i, 0)),
            scratch_shapes=[
                pltpu.VMEM((n_heads, tq, 1), jnp.float32),   # m (running max)
                pltpu.VMEM((n_heads, tq, 1), jnp.float32),   # l (running sum)
                pltpu.VMEM((tq, D), jnp.float32),            # acc (lane-dense)
            ]),
        compiler_params=pltpu.CompilerParams(
            dimension_semantics=("parallel", "parallel", "arbitrary"),
            vmem_limit_bytes=_vmem_limit(attn_est)),
    )(q, k, v, x, wo, params["bo"])

    if squeeze:
        out = out[:, 0, :]
    return out


# --------------------------------------------------------------------------
# Pure-JAX f32 reference mirroring the PyTorch module (eval mode, mask=None).
# --------------------------------------------------------------------------
def reference(x, params, *, n_heads):
    squeeze = (x.ndim == 2)
    if squeeze:
        x = x[:, None, :]
    B, S, D = x.shape
    d_k = D // n_heads
    mean = x.mean(-1, keepdims=True)
    var = ((x - mean) ** 2).mean(-1, keepdims=True)
    xn = (x - mean) / jnp.sqrt(var + 1e-5) * params["gamma"] + params["beta"]
    q = xn @ params["wq"] + params["bq"]
    k = xn @ params["wk"] + params["bk"]
    v = xn @ params["wv"] + params["bv"]
    qh = q.reshape(B, S, n_heads, d_k).transpose(0, 2, 1, 3)
    kh = k.reshape(B, S, n_heads, d_k).transpose(0, 2, 1, 3)
    vh = v.reshape(B, S, n_heads, d_k).transpose(0, 2, 1, 3)
    scores = (qh @ kh.transpose(0, 1, 3, 2)) / math.sqrt(d_k)
    p_attn = jax.nn.softmax(scores, axis=-1)
    ctx = (p_attn @ vh).transpose(0, 2, 1, 3).reshape(B, S, D)
    out = ctx @ params["wo"] + params["bo"] + x
    if squeeze:
        out = out[:, 0, :]
    return out


def init_params(key, hidden):
    """Deterministic synthetic parameter init (LayerNorm + 4 Linear layers)."""
    ks = jax.random.split(key, 8)
    scale = 1.0 / math.sqrt(hidden)
    return {
        "gamma": jnp.ones((1, hidden), jnp.float32),
        "beta": jnp.zeros((1, hidden), jnp.float32),
        "wq": jax.random.normal(ks[0], (hidden, hidden), jnp.float32) * scale,
        "bq": jax.random.normal(ks[1], (1, hidden), jnp.float32) * 0.02,
        "wk": jax.random.normal(ks[2], (hidden, hidden), jnp.float32) * scale,
        "bk": jax.random.normal(ks[3], (1, hidden), jnp.float32) * 0.02,
        "wv": jax.random.normal(ks[4], (hidden, hidden), jnp.float32) * scale,
        "bv": jax.random.normal(ks[5], (1, hidden), jnp.float32) * 0.02,
        "wo": jax.random.normal(ks[6], (hidden, hidden), jnp.float32) * scale,
        "bo": jax.random.normal(ks[7], (1, hidden), jnp.float32) * 0.02,
    }


if __name__ == "__main__":
    # Small shapes; S=16 with TQ=TKV=8 exercises the multi-query-tile and
    # multi-KV-tile (online-softmax) paths of both kernels.
    B, S, HIDDEN, HEADS = 2, 16, 32, 4
    TQ, TKV = 8, 8

    key = jax.random.PRNGKey(0)
    k_x, k_p = jax.random.split(key)
    x = jax.random.normal(k_x, (B, S, HIDDEN), jnp.float32)
    params_f32 = init_params(k_p, HIDDEN)
    params = prepare_params(params_f32)       # one-time bf16 weight cast

    out = attention_qkv(x, params, n_heads=HEADS, tq=TQ, tkv=TKV)
    out = jax.block_until_ready(out)

    ref = reference(x, params_f32, n_heads=HEADS)
    assert out.shape == ref.shape == (B, S, HIDDEN)
    err = float(jnp.max(jnp.abs(out - ref)))
    # bf16 matmul operands + approx reciprocal vs f32 reference -> loose tolerance.
    assert jnp.allclose(out, ref, atol=1e-1, rtol=1e-1), f"max abs err {err}"

    print("KERNEL_OK")
</pallas_src>

<mosaic_0001>
module attributes {stable_mosaic.version = 11 : i64} {
  func.func @_qkv_proj_kernel(%arg0: i32, %arg1: i32, %arg2: i32, %arg3: memref<1x16x32xf32, #tpu.memory_space<vmem>>, %arg4: memref<1x32xf32, #tpu.memory_space<vmem>>, %arg5: memref<1x32xf32, #tpu.memory_space<vmem>>, %arg6: memref<32x32xbf16, #tpu.memory_space<vmem>>, %arg7: memref<1x32xf32, #tpu.memory_space<vmem>>, %arg8: memref<32x32xbf16, #tpu.memory_space<vmem>>, %arg9: memref<1x32xf32, #tpu.memory_space<vmem>>, %arg10: memref<32x32xbf16, #tpu.memory_space<vmem>>, %arg11: memref<1x32xf32, #tpu.memory_space<vmem>>, %arg12: memref<1x16x32xbf16, #tpu.memory_space<vmem>>, %arg13: memref<1x16x32xbf16, #tpu.memory_space<vmem>>, %arg14: memref<1x16x32xbf16, #tpu.memory_space<vmem>>, %arg15: memref<16x32xbf16, #tpu.memory_space<vmem>>) attributes {dimension_semantics = [#tpu.dimension_semantics<parallel>, #tpu.dimension_semantics<parallel>, #tpu.dimension_semantics<arbitrary>], iteration_bounds = array<i64: 2, 1, 1>, scalar_prefetch = 0 : i64, scratch_operands = 1 : i64, tpu.core_type = #tpu.core_type<tc>, window_params = [{transform_indices = @transform_0, window_bounds = array<i64: 1, 16, 32>}, {pipeline_mode = #tpu.pipeline_mode<synchronous>, transform_indices = @transform_1, window_bounds = array<i64: 1, 32>}, {pipeline_mode = #tpu.pipeline_mode<synchronous>, transform_indices = @transform_2, window_bounds = array<i64: 1, 32>}, {transform_indices = @transform_3, window_bounds = array<i64: 32, 32>}, {transform_indices = @transform_4, window_bounds = array<i64: 1, 32>}, {transform_indices = @transform_5, window_bounds = array<i64: 32, 32>}, {transform_indices = @transform_6, window_bounds = array<i64: 1, 32>}, {transform_indices = @transform_7, window_bounds = array<i64: 32, 32>}, {transform_indices = @transform_8, window_bounds = array<i64: 1, 32>}, {transform_indices = @transform_9, window_bounds = array<i64: 1, 16, 32>}, {transform_indices = @transform_10, window_bounds = array<i64: 1, 16, 32>}, {transform_indices = @transform_11, window_bounds = array<i64: 1, 16, 32>}]} {
    %c0_i32 = arith.constant 0 : i32
    %0 = arith.cmpi eq, %arg2, %c0_i32 : i32
    %1 = arith.extui %0 : i1 to i32
    %c0_i32_0 = arith.constant 0 : i32
    %2 = arith.cmpi ne, %1, %c0_i32_0 : i32
    scf.if %2 {
      %c0_26 = arith.constant 0 : index
      %c0_27 = arith.constant 0 : index
      %c0_28 = arith.constant 0 : index
      %33 = vector.load %arg3[%c0_26, %c0_27, %c0_28] : memref<1x16x32xf32, #tpu.memory_space<vmem>>, vector<1x16x32xf32>
      %34 = vector.shape_cast %33 : vector<1x16x32xf32> to vector<16x32xf32>
      %cst_29 = arith.constant dense<0.000000e+00> : vector<16xf32>
      %35 = vector.multi_reduction <add>, %34, %cst_29 [1] : vector<16x32xf32> to vector<16xf32>
      %36 = vector.shape_cast %35 : vector<16xf32> to vector<16x1xf32>
      %cst_30 = arith.constant 3.200000e+01 : f32
      %37 = vector.broadcast %cst_30 : f32 to vector<16x1xf32>
      %38 = arith.divf %36, %37 : vector<16x1xf32>
      %39 = vector.broadcast %38 : vector<16x1xf32> to vector<16x32xf32>
      %40 = arith.subf %34, %39 : vector<16x32xf32>
      %41 = arith.mulf %40, %40 : vector<16x32xf32>
      %cst_31 = arith.constant dense<0.000000e+00> : vector<16xf32>
      %42 = vector.multi_reduction <add>, %41, %cst_31 [1] : vector<16x32xf32> to vector<16xf32>
      %43 = vector.shape_cast %42 : vector<16xf32> to vector<16x1xf32>
      %cst_32 = arith.constant 3.200000e+01 : f32
      %44 = vector.broadcast %cst_32 : f32 to vector<16x1xf32>
      %45 = arith.divf %43, %44 : vector<16x1xf32>
      %46 = vector.broadcast %38 : vector<16x1xf32> to vector<16x32xf32>
      %47 = arith.subf %34, %46 : vector<16x32xf32>
      %cst_33 = arith.constant 9.99999974E-6 : f32
      %48 = vector.broadcast %cst_33 : f32 to vector<16x1xf32>
      %49 = arith.addf %45, %48 : vector<16x1xf32>
      %50 = math.rsqrt %49 : vector<16x1xf32>
      %51 = vector.broadcast %50 : vector<16x1xf32> to vector<16x32xf32>
      %52 = arith.mulf %47, %51 : vector<16x32xf32>
      %c0_34 = arith.constant 0 : index
      %c0_35 = arith.constant 0 : index
      %53 = vector.load %arg4[%c0_34, %c0_35] : memref<1x32xf32, #tpu.memory_space<vmem>>, vector<1x32xf32>
      %54 = vector.broadcast %53 : vector<1x32xf32> to vector<16x32xf32>
      %55 = arith.mulf %52, %54 : vector<16x32xf32>
      %c0_36 = arith.constant 0 : index
      %c0_37 = arith.constant 0 : index
      %56 = vector.load %arg5[%c0_36, %c0_37] : memref<1x32xf32, #tpu.memory_space<vmem>>, vector<1x32xf32>
      %57 = vector.broadcast %56 : vector<1x32xf32> to vector<16x32xf32>
      %58 = arith.addf %55, %57 : vector<16x32xf32>
      %59 = arith.truncf %58 : vector<16x32xf32> to vector<16x32xbf16>
      %c0_38 = arith.constant 0 : index
      %c0_39 = arith.constant 0 : index
      %60 = vector.load %arg15[%c0_38, %c0_39] : memref<16x32xbf16, #tpu.memory_space<vmem>>, vector<16x32xbf16>
      tpu.vector_store %arg15[%c0_38, %c0_39], %59 {strides = array<i32>} : memref<16x32xbf16, #tpu.memory_space<vmem>>, vector<16x32xbf16>,
    } else {
    }
    %c0 = arith.constant 0 : index
    %c0_1 = arith.constant 0 : index
    %3 = vector.load %arg15[%c0, %c0_1] : memref<16x32xbf16, #tpu.memory_space<vmem>>, vector<16x32xbf16>
    %c0_2 = arith.constant 0 : index
    %c0_3 = arith.constant 0 : index
    %4 = vector.load %arg6[%c0_2, %c0_3] : memref<32x32xbf16, #tpu.memory_space<vmem>>, vector<32x32xbf16>
    %cst = arith.constant dense<0.000000e+00> : vector<16x32xf32>
    %5 = tpu.matmul %3, %4, %cst {dimension_numbers = #tpu.dot_dimension_numbers<[1], [0], [0], [1], [0, 0, 1, 1], [], []>} : vector<16x32xbf16>, vector<32x32xbf16>, vector<16x32xf32> -> vector<16x32xf32>
    %c0_4 = arith.constant 0 : index
    %c0_5 = arith.constant 0 : index
    %6 = vector.load %arg7[%c0_4, %c0_5] : memref<1x32xf32, #tpu.memory_space<vmem>>, vector<1x32xf32>
    %7 = vector.broadcast %6 : vector<1x32xf32> to vector<16x32xf32>
    %8 = arith.addf %5, %7 : vector<16x32xf32>
    %cst_6 = arith.constant 0.353553385 : f32
    %9 = vector.broadcast %cst_6 : f32 to vector<16x32xf32>
    %10 = arith.mulf %8, %9 : vector<16x32xf32>
    %11 = arith.truncf %10 : vector<16x32xf32> to vector<16x32xbf16>
    %c0_7 = arith.constant 0 : index
    %c0_8 = arith.constant 0 : index
    %c0_9 = arith.constant 0 : index
    %12 = vector.load %arg12[%c0_7, %c0_8, %c0_9] : memref<1x16x32xbf16, #tpu.memory_space<vmem>>, vector<1x16x32xbf16>
    %13 = vector.shape_cast %12 : vector<1x16x32xbf16> to vector<16x32xbf16>
    %14 = vector.shape_cast %11 : vector<16x32xbf16> to vector<1x16x32xbf16>
    tpu.vector_store %arg12[%c0_7, %c0_8, %c0_9], %14 {strides = array<i32>} : memref<1x16x32xbf16, #tpu.memory_space<vmem>>, vector<1x16x32xbf16>,
    %c0_10 = arith.constant 0 : index
    %c0_11 = arith.constant 0 : index
    %15 = vector.load %arg8[%c0_10, %c0_11] : memref<32x32xbf16, #tpu.memory_space<vmem>>, vector<32x32xbf16>
    %cst_12 = arith.constant dense<0.000000e+00> : vector<16x32xf32>
    %16 = tpu.matmul %3, %15, %cst_12 {dimension_numbers = #tpu.dot_dimension_numbers<[1], [0], [0], [1], [0, 0, 1, 1], [], []>} : vector<16x32xbf16>, vector<32x32xbf16>, vector<16x32xf32> -> vector<16x32xf32>
    %c0_13 = arith.constant 0 : index
    %c0_14 = arith.constant 0 : index
    %17 = vector.load %arg9[%c0_13, %c0_14] : memref<1x32xf32, #tpu.memory_space<vmem>>, vector<1x32xf32>
    %18 = vector.broadcast %17 : vector<1x32xf32> to vector<16x32xf32>
    %19 = arith.addf %16, %18 : vector<16x32xf32>
    %20 = arith.truncf %19 : vector<16x32xf32> to vector<16x32xbf16>
    %c0_15 = arith.constant 0 : index
    %c0_16 = arith.constant 0 : index
    %c0_17 = arith.constant 0 : index
    %21 = vector.load %arg13[%c0_15, %c0_16, %c0_17] : memref<1x16x32xbf16, #tpu.memory_space<vmem>>, vector<1x16x32xbf16>
    %22 = vector.shape_cast %21 : vector<1x16x32xbf16> to vector<16x32xbf16>
    %23 = vector.shape_cast %20 : vector<16x32xbf16> to vector<1x16x32xbf16>
    tpu.vector_store %arg13[%c0_15, %c0_16, %c0_17], %23 {strides = array<i32>} : memref<1x16x32xbf16, #tpu.memory_space<vmem>>, vector<1x16x32xbf16>,
    %c0_18 = arith.constant 0 : index
    %c0_19 = arith.constant 0 : index
    %24 = vector.load %arg10[%c0_18, %c0_19] : memref<32x32xbf16, #tpu.memory_space<vmem>>, vector<32x32xbf16>
    %cst_20 = arith.constant dense<0.000000e+00> : vector<16x32xf32>
    %25 = tpu.matmul %3, %24, %cst_20 {dimension_numbers = #tpu.dot_dimension_numbers<[1], [0], [0], [1], [0, 0, 1, 1], [], []>} : vector<16x32xbf16>, vector<32x32xbf16>, vector<16x32xf32> -> vector<16x32xf32>
    %c0_21 = arith.constant 0 : index
    %c0_22 = arith.constant 0 : index
    %26 = vector.load %arg11[%c0_21, %c0_22] : memref<1x32xf32, #tpu.memory_space<vmem>>, vector<1x32xf32>
    %27 = vector.broadcast %26 : vector<1x32xf32> to vector<16x32xf32>
    %28 = arith.addf %25, %27 : vector<16x32xf32>
    %29 = arith.truncf %28 : vector<16x32xf32> to vector<16x32xbf16>
    %c0_23 = arith.constant 0 : index
    %c0_24 = arith.constant 0 : index
    %c0_25 = arith.constant 0 : index
    %30 = vector.load %arg14[%c0_23, %c0_24, %c0_25] : memref<1x16x32xbf16, #tpu.memory_space<vmem>>, vector<1x16x32xbf16>
    %31 = vector.shape_cast %30 : vector<1x16x32xbf16> to vector<16x32xbf16>
    %32 = vector.shape_cast %29 : vector<16x32xbf16> to vector<1x16x32xbf16>
    tpu.vector_store %arg14[%c0_23, %c0_24, %c0_25], %32 {strides = array<i32>} : memref<1x16x32xbf16, #tpu.memory_space<vmem>>, vector<1x16x32xbf16>,
    return
  }
  func.func @transform_0(%arg0: i32, %arg1: i32, %arg2: i32) -> (i32, i32, i32) {
    %c0_i32 = arith.constant 0 : i32
    %c0_i32_0 = arith.constant 0 : i32
    return %arg0, %arg1, %c0_i32 : i32, i32, i32
  }
  func.func @transform_1(%arg0: i32, %arg1: i32, %arg2: i32) -> (i32, i32) {
    %c0_i32 = arith.constant 0 : i32
    %c0_i32_0 = arith.constant 0 : i32
    %c0_i32_1 = arith.constant 0 : i32
    return %c0_i32, %c0_i32_0 : i32, i32
  }
  func.func @transform_2(%arg0: i32, %arg1: i32, %arg2: i32) -> (i32, i32) {
    %c0_i32 = arith.constant 0 : i32
    %c0_i32_0 = arith.constant 0 : i32
    %c0_i32_1 = arith.constant 0 : i32
    return %c0_i32, %c0_i32_0 : i32, i32
  }
  func.func @transform_3(%arg0: i32, %arg1: i32, %arg2: i32) -> (i32, i32) {
    %c0_i32 = arith.constant 0 : i32
    %c0_i32_0 = arith.constant 0 : i32
    return %c0_i32, %arg2 : i32, i32
  }
  func.func @transform_4(%arg0: i32, %arg1: i32, %arg2: i32) -> (i32, i32) {
    %c0_i32 = arith.constant 0 : i32
    %c0_i32_0 = arith.constant 0 : i32
    return %c0_i32, %arg2 : i32, i32
  }
  func.func @transform_5(%arg0: i32, %arg1: i32, %arg2: i32) -> (i32, i32) {
    %c0_i32 = arith.constant 0 : i32
    %c0_i32_0 = arith.constant 0 : i32
    return %c0_i32, %arg2 : i32, i32
  }
  func.func @transform_6(%arg0: i32, %arg1: i32, %arg2: i32) -> (i32, i32) {
    %c0_i32 = arith.constant 0 : i32
    %c0_i32_0 = arith.constant 0 : i32
    return %c0_i32, %arg2 : i32, i32
  }
  func.func @transform_7(%arg0: i32, %arg1: i32, %arg2: i32) -> (i32, i32) {
    %c0_i32 = arith.constant 0 : i32
    %c0_i32_0 = arith.constant 0 : i32
    return %c0_i32, %arg2 : i32, i32
  }
  func.func @transform_8(%arg0: i32, %arg1: i32, %arg2: i32) -> (i32, i32) {
    %c0_i32 = arith.constant 0 : i32
    %c0_i32_0 = arith.constant 0 : i32
    return %c0_i32, %arg2 : i32, i32
  }
  func.func @transform_9(%arg0: i32, %arg1: i32, %arg2: i32) -> (i32, i32, i32) {
    %c0_i32 = arith.constant 0 : i32
    return %arg0, %arg1, %arg2 : i32, i32, i32
  }
  func.func @transform_10(%arg0: i32, %arg1: i32, %arg2: i32) -> (i32, i32, i32) {
    %c0_i32 = arith.constant 0 : i32
    return %arg0, %arg1, %arg2 : i32, i32, i32
  }
  func.func @transform_11(%arg0: i32, %arg1: i32, %arg2: i32) -> (i32, i32, i32) {
    %c0_i32 = arith.constant 0 : i32
    return %arg0, %arg1, %arg2 : i32, i32, i32
  }
}

</mosaic_0001>

<bundles_post_ra>
// kernel: tpu_custom_call.1
= control target key start
LH: loop header
LB: loop body
LE: loop exit
PB: predicated region body
PF: predicated region fallthrough
CT: control target
= control target key end

     0   :  { %s2040_s0 = inlined_call_operand.hbm [shape: f32[2,16,32], index: 0, kind: input, shape index: {}]   ;;  %s2041_s1 = inlined_call_operand.vmem [shape: f32[1,32], index: 1, kind: input, shape index: {}]   ;;  %s2042_s2 = inlined_call_operand.vmem [shape: f32[1,32], index: 2, kind: input, shape index: {}]   ;;  %s2043_s3 = inlined_call_operand.hbm [shape: bf16[32,32], index: 3, kind: input, shape index: {}]   ;;  %s2044_s4 = inlined_call_operand.vmem [shape: f32[1,32], index: 4, kind: input, shape index: {}]   ;;  %s2045_s5 = inlined_call_operand.hbm [shape: bf16[32,32], index: 5, kind: input, shape index: {}]   ;;  %s2046_s6 = inlined_call_operand.vmem [shape: f32[1,32], index: 6, kind: input, shape index: {}]   ;;  %s2047_s7 = inlined_call_operand.hbm [shape: bf16[32,32], index: 7, kind: input, shape index: {}]   ;;  %s2048_s8 = inlined_call_operand.vmem [shape: f32[1,32], index: 8, kind: input, shape index: {}]   ;;  %s2049_s9 = inlined_call_operand.hbm [shape: bf16[2,16,32], index: 9, kind: output, shape index: {0}]   ;;  %s2050_s10 = inlined_call_operand.hbm [shape: bf16[2,16,32], index: 10, kind: output, shape index: {1}]   ;;  %s2051_s11 = inlined_call_operand.hbm [shape: bf16[2,16,32], index: 11, kind: output, shape index: {2}]  }
   0x1   :  { %2059 = sst [smem:[#allocation23_spill]] %s2040_s0 }
   0x2   :  { %2060 = sst [smem:[#allocation24_spill]] %s2043_s3 }
   0x3   :  { %2061 = sst [smem:[#allocation25_spill]] %s2045_s5 }
   0x4   :  { %2062 = sst [smem:[#allocation26_spill]] %s2047_s7 }
   0x5   :  { %2063 = sst [smem:[#allocation27_spill]] %s2051_s11 }
   0x6   :  { %17 = vsyncpa [#allocation4], 0 }
   0x7   :  { %19 = vsyncpa [#allocation4 + $0x1], 0 }
   0x8   :  { %20 = vsyncpa [#allocation7], 0 }
   0x9   :  { %21 = vsyncpa [#allocation10], 0 }
   0xa   :  { %22 = vsyncpa [#allocation5], 0 }
   0xb   :  { %24 = vsyncpa [#allocation5 + $0x1], 0 }
   0xc   :  { %25 = vsyncpa [#allocation13], 0 }
   0xd   :  { %27 = vsyncpa [#allocation13 + $0x1], 0  ;;  %s1714_s17 = smov 0   ;;  %s1716_s18 = smov 0  }
   0xe   :  { %s1718_s19 = smov 0   ;;  %s1720_s20 = smov 0  }
   0xf   :  { %s1722_s21 = smov 0   ;;  %s1724_s22 = smov 0  }
  0x10 LB: > { %2064 = sst [smem:[#allocation20_spill]] %s1617_s17  ;;  %s1745_s23 = sadd.s32 4294967295, %s1637_s22   ;;  %s1637_s22 = sphi %s1724_s22, %s33_s22   ;;  %s1633_s21 = sphi %s1722_s21, %s2094_s21   ;;  %s1629_s20 = sphi %s1720_s20, %s2093_s20   ;;  %s1625_s19 = sphi %s1718_s19, %s2092_s19   ;;  %s1621_s18 = sphi %s1716_s18, %s2091_s18   ;;  %s1617_s17 = sphi %s1714_s17, %s2090_s17  }
  0x11   : > { %s2052_s24 = sadd.s32 4294967294, %s1637_s22   ;;  %p74_p0 = scmp.ne.s32.totalorder %s1621_s18, %s1617_s17 }
  0x12   : > { %p2054_p1 = scmp.eq.s32.totalorder %s1745_s23, 0  ;;  %p306_p3 = scmp.eq.s32.totalorder %s2052_s24, 1 }
  0x13   : > { %p1167_p5 = scmp.ge.s32.totalorder %s1637_s22, 1  ;;  %p373_p7 = scmp.lt.s32.totalorder %s1637_s22, 3 }
  0x14   : > { %p1756_p4 = por %p2054_p1, %p74_p0  ;;  %p1761_p6 = por %p306_p3, %p74_p0 }
  0x15   : > { %p1766_p8 = pnand %p1167_p5, %p373_p7  ;;  %s1639_s28 = smov [#allocation6]  }
  0x16   : > { %s2065_s25 = scalar_select %p1756_p4, 1, 0 }
  0x17   : > { %s2066_s26 = scalar_select %p1761_p6, 1, 0 }
  0x18   : > { %s393_s29 = sshll.u32 %s1639_s28, 4  ;;  %p1285_p9 = pneg %p1766_p8  ;;  %s394_s29 = int_to_ptr.vmem [resolvable:$true] %s393_s29 }
  0x19   : > { %2067 = sst [smem:[#allocation21_spill]] %s2066_s26  ;;  %s1640_s12 = smov [#allocation8]  }
  0x1a   : > { %p1775_p11 = pnand %p1285_p9, %p2054_p1  ;;  %s414_s13 = sshll.u32 %s1640_s12, 4  ;;  %s415_s13 = int_to_ptr.vmem [resolvable:$true] %s414_s13 }
  0x1b   : > { %s1641_s14 = smov [#allocation9]   ;;  %s1398_s16 = scalar_lea.vmem %s394_s29, 256 }
  0x1c   : > { %s435_s15 = sshll.u32 %s1641_s14, 4  ;;  %p1389_p12 = pneg %p1775_p11  ;;  %s436_s15 = int_to_ptr.vmem [resolvable:$true] %s435_s15 }
  0x1d   : > { %p1399_p13 = scmp.ne.s32.totalorder %s394_s29, %s1398_s16  ;;  %p1406_p5 = scmp.lt.s32.totalorder %s394_s29, %s394_s29 }
  0x1e   : > { %p1407_p7 = scmp.lt.s32.totalorder %s1398_s16, %s1398_s16 }
  0x1f   : > { %p1401_p0 = pnand %p1399_p13, %p1389_p12 }
  0x20   : > { %p1408_p9 = por %p1407_p7, %p1406_p5 }
  0x21   : > { %p1402_p3 = pneg %p1401_p0 }
  0x23   : > { %p1409_p10 = pnand %p1408_p9, %p1402_p3 }
  0x25   : > { %1412 = shalt.err (!%p1409_p10)
}
  0x26   : > { %s1642_s28 = smov 64   ;;  %s1643_s12 = smov 4  }
  0x27   : > { %s2070_s3 = sld [smem:[#allocation24_spill]]  ;;  %s1424_s26 = scalar_lea.vmem %s415_s13, 256 }
  0x28   : > { %p1425_p1 = scmp.ne.s32.totalorder %s415_s13, %s1424_s26  ;;  %p1432_p2 = scmp.lt.s32.totalorder %s415_s13, %s415_s13 }
  0x29   : > { %p1433_p6 = scmp.lt.s32.totalorder %s1424_s26, %s1424_s26 }
  0x2a   : > { %p1427_p13 = pnand %p1425_p1, %p1389_p12 }
  0x2b   : > { %p1434_p5 = por %p1433_p6, %p1432_p2 }
  0x2c   : > { %p1428_p0 = pneg %p1427_p13 }
  0x2d   : > { %1288 = dma.hbm_to_vmem [thread:$0]  (!%p1775_p11), %s2070_s3, 256, %s394_s29, [#allocation7], %s1642_s28, %s1642_s28, %s1643_s12  }
  0x2e   : > { %p1435_p3 = pnand %p1434_p5, %p1428_p0 }
  0x30   : > { %1438 = shalt.err (!%p1435_p3)
}
  0x31   : > { %s2071_s5 = sld [smem:[#allocation25_spill]]  ;;  %s1450_s24 = scalar_lea.vmem %s436_s15, 256 }
  0x32   : > { %p1451_p10 = scmp.ne.s32.totalorder %s436_s15, %s1450_s24  ;;  %p1458_p9 = scmp.lt.s32.totalorder %s436_s15, %s436_s15 }
  0x33   : > { %p1459_p13 = scmp.lt.s32.totalorder %s1450_s24, %s1450_s24 }
  0x34   : > { %p1453_p7 = pnand %p1451_p10, %p1389_p12 }
  0x35   : > { %p1460_p4 = por %p1459_p13, %p1458_p9 }
  0x36   : > { %p1454_p1 = pneg %p1453_p7 }
  0x37   : > { %1291 = dma.hbm_to_vmem [thread:$0]  (!%p1775_p11), %s2071_s5, 256, %s415_s13, [#allocation7], %s1642_s28, %s1642_s28, %s1643_s12  }
  0x38   : > { %p1461_p2 = pnand %p1460_p4, %p1454_p1 }
  0x3a   : > { %1464 = shalt.err (!%p1461_p2)
}
  0x3b   : > { %s2072_s7 = sld [smem:[#allocation26_spill]]  ;;  %s61_s17 = sadd.s32 1, %s1625_s19 }
  0x3c   : > { %s52_s13 = sadd.s32 1, %s1633_s21  ;;  %p68_p4 = scmp.ne.s32.totalorder %s1625_s19, %s1621_s18 }
  0x3d   : > { %p54_p6 = scmp.ge.s32.totalorder %s52_s13, 2  ;;  %p69_p12 = scmp.eq.s32.totalorder %s1637_s22, 0 }
  0x3e   : > { %p2073_p0 = scmp.eq.s32.totalorder %s1745_s23, 1  ;;  %p1312_p3 = scmp.lt.s32.totalorder %s1637_s22, 2 }
  0x3f   : > { %s2096_s13 = smov (%p54_p6, %s52_s13), 0  ;;  %p70_p10 = por %p69_p12, %p68_p4 }
  0x40   : > { %p1812_p5 = por %p2073_p0, %p68_p4  ;;  %2075 = sst [smem:[#allocation22_spill]] %s2096_s13 }
  0x41   : > { %1294 = dma.hbm_to_vmem [thread:$0]  (!%p1775_p11), %s2072_s7, 256, %s436_s15, [#allocation10], %s1642_s28, %s1642_s28, %s1643_s12  }
  0x42   : > { %s455_s14 = sand.u32 1, %s1625_s19   ;;  %s56_s16 = ssub.s32 %s1633_s21, %s2096_s13 }
  0x43   : > { %p59_p7 = scmp.eq.s32.totalorder %s56_s16, 0  ;;  %s1175_s15 = sshll.u32 %s455_s14, 4 }
  0x44   : > { %s1220_s28 = sshll.u32 %s1633_s21, 8  ;;  %s2076_s0 = sld [smem:[#allocation23_spill]] }
  0x45   : > { %s1824_s12 = scalar_select %p59_p7, %s1625_s19, %s61_s17  }
  0x46   : > { %s459_s3 = scalar_lea.vmem [#allocation3], %s1175_s15  ;;  %p1831_p11 = pnand %p1312_p3, %p70_p10 }
  0x47   : > { %s468_s5 = sshll.u32 %s459_s3, 4  ;;  %s456_s11 = scalar_lea.sflag [#allocation4], %s455_s14  ;;  %s469_s5 = int_to_ptr.vmem [resolvable:$true] %s468_s5 }
  0x48   : > { %p1467_p1 = pneg %p1831_p11  ;;  %s1478_s16 = scalar_lea.vmem %s469_s5, 256 }
  0x49   : > { %p1479_p9 = scmp.ne.s32.totalorder %s469_s5, %s1478_s16  ;;  %s1644_s17 = smov [#allocation3]  }
  0x4a   : > { %s467_s29 = scalar_lea.hbm %s2076_s0, %s1220_s28  ;;  %s1483_s13 = sshll.u32 %s1644_s17, 4  ;;  %s1484_s13 = int_to_ptr.vmem [resolvable:$false] %s1483_s13 }
  0x4b   : > { %p1481_p13 = pnand %p1479_p9, %p1467_p1  ;;  %s1485_s28 = scalar_lea.vmem %s1484_s13, 512 }
  0x4c   : > { %p1486_p4 = scmp.lt.s32.totalorder %s469_s5, %s1484_s13  ;;  %p1487_p6 = scmp.lt.s32.totalorder %s1485_s28, %s1478_s16 }
  0x4d   : > { %p1482_p2 = pneg %p1481_p13 }
  0x4e   : > { %p1488_p12 = por %p1487_p6, %p1486_p4 }
  0x50   : > { %p1489_p0 = pnand %p1488_p12, %p1482_p2 }
  0x52   : > { %1492 = shalt.err (!%p1489_p0)
}
  0x53   : > { %s1645_s3 = smov 128   ;;  %s1646_s15 = smov 8  }
  0x54   : > { %1298 = dma.hbm_to_vmem [thread:$0]  (!%p1831_p11), %s467_s29, 256, %s469_s5, %s456_s11, %s1645_s3, %s1645_s3, %s1646_s15  }
  0x55   : > { %480 = sbr.rel (%p1766_p8) target bundleno = 687 (0x2af), region = 56  ;;  %s1842_s14 = sand.u32 (!%p1766_p8), 1, %s1621_s18  }
  0x56   : > { %s1179_s24 = sshll.u32 (!%p1766_p8), %s1842_s14, 4  ;;  %s483_s13 = scalar_lea.sflag (!%p1766_p8), [#allocation4], %s1842_s14 }
  0x57   : > { %s486_s26 = scalar_lea.vmem (!%p1766_p8), [#allocation3], %s1179_s24  ;;  %p2078_p3 = scmp.ne.s32.totalorder (!%p1766_p8), %s2065_s25, 0 }
  0x5a   : > { %1596 = dma.done.wait (%p2078_p3), %s483_s13, 256  }
  0x5b   : > { %1598 = vsyncadd (%p2078_p3), %s483_s13, 4294967040  ;;  %p2079_p10 = scmp.eq.s32.totalorder %s1745_s23, 0 }
  0x5d   : > { %1600 = dma.done.wait (%p2079_p10), [#allocation7], 512   ;;  %p2080_p7 = pmov %p2079_p10 }
  0x5f   : > { %1602 = vsyncadd (%p2080_p7), [#allocation7], 4294966784  ;;  %p2081_p8 = pmov %p2080_p7 }
  0x60   : > { %p2082_p11 = pmov %p2080_p7 }
  0x61   : > { %1604 = dma.done.wait (%p2081_p8), [#allocation10], 256  }
  0x62   : > { %1606 = vsyncadd (%p2082_p11), [#allocation10], 4294967040  ;;  %vm576_vm0 = vcmask 261120   ;;  %v574_v0 = vld [vmem:[%s486_s26] sm:$0xff]  ;;  %v575_v1 = vld [vmem:[%s486_s26 + $0x8] sm:$0xff]  ;;  %v1647_v16 = vmov 0.0  }
  0x63   : > { %v577_v2 = vsel %vm576_vm0, %v574_v0, 0.0  ;;  %v580_v3 = vsel %vm576_vm0, %v575_v1, 0.0  ;;  %v1376_v14 = vld [vmem:[#allocation6 + $0x8] sm:$0xff]   ;;  %v1377_v15 = vld [vmem:[#allocation8 + $0x8] sm:$0xff]   ;;  %1241 = vmatprep.subr.bf16.mxu0 %v1647_v16  ;;  %1249 = vmatprep.subr.bf16.mxu1 %v1647_v16  ;;  %v1378_v17 = vld [vmem:[#allocation6] sm:$0xff]   ;;  %vm1648_vm1 = vmmov 0  }
  0x64   : > { %578 = vadd.xlane.f32.xlu0 %v577_v2  ;;  %1242 = vmatpush3.bf16.msra.mxu0 %v1376_v14  ;;  %v1379_v18 = vld [vmem:[#allocation8] sm:$0xff]   ;;  %v1186_v26 = vld [vmem:[%s2041_s1] ss:$0 sm:$0xff]  ;;  %vm630_vm2 = vcmask 257024   ;;  %v1381_v37 = vld [vmem:[#allocation9 + $0x8] sm:$0xff]   ;;  %s1883_s28 = sshll.u32 %s1842_s14, 3 }
  0x65   : > { %1250 = vmatpush3.bf16.msra.mxu1 %v1377_v15  ;;  %1243 = vmatprep.subr.bf16.mxu0 %v1647_v16  ;;  %v1187_v28 = vld [vmem:[%s2042_s2] ss:$0 sm:$0xff]  ;;  %v1382_v39 = vld [vmem:[#allocation9] sm:$0xff]   ;;  %s874_s3 = sand.u32 1, %s1745_s23   ;;  %s548_s15 = scalar_lea.vmem [#allocation12], %s1883_s28 }
  0x66   : > { %1251 = vmatprep.subr.bf16.mxu1 %v1647_v16  ;;  %1245 = vmatprep.mubr.msk.bf16.mxu0 %vm1648_vm1, %v1647_v16  ;;  %v1190_v40 = vld [vmem:[%s2044_s4] ss:$0 sm:$0xff]  ;;  %s915_s24 = sshll.u32 %s548_s15, 4  ;;  %s1888_s13 = sshll.u32 %s1629_s20, 7  ;;  %s1908_s24 = int_to_ptr.vmem [resolvable:$true] %s915_s24 }
  0x67   : > { %1253 = vmatprep.mubr.msk.bf16.mxu1 %vm1648_vm1, %v1647_v16  ;;  %v1197_v41 = vld [vmem:[%s2046_s6] ss:$0 sm:$0xff]  ;;  %s1897_s23 = scalar_lea.vmem [#allocation11], %s1883_s28  ;;  %s1906_s25 = scalar_lea.hbm %s2050_s10, %s1888_s13 }
  0x68   : > { %581 = vadd.xlane.f32.xlu0 %v580_v3  ;;  %1244 = vmatpush3.bf16.msra.mxu0 %v1378_v17  ;;  %v1894_v57 = vld [vmem:[%s2048_s8] ss:$0 sm:$0xff]  ;;  %s896_s20 = sshll.u32 %s1897_s23, 4  ;;  %s1916_s16 = scalar_lea.hbm %s2049_s9, %s1888_s13  ;;  %s1918_s20 = int_to_ptr.vmem [resolvable:$true] %s896_s20 }
  0x69   : > { %1252 = vmatpush3.bf16.msra.mxu1 %v1379_v18  ;;  %1257 = vmatprep.subr.bf16.mxu0 %v1647_v16  ;;  %s1920_s17 = scalar_lea.sflag [#allocation13], %s874_s3  ;;  %s1493_s26 = scalar_lea.vmem %s1908_s24, 128 }
  0x6a   : > { %p1494_p1 = scmp.ne.s32.totalorder %s1908_s24, %s1493_s26  ;;  %s1649_s5 = smov [#allocation12]  }
  0x6b   : > { %s1497_s7 = sshll.u32 %s1649_s5, 4  ;;  %s1498_s7 = int_to_ptr.vmem [resolvable:$false] %s1497_s7 }
  0x6c   : > { %p1495_p9 = pnand %p1494_p1, %p1812_p5  ;;  %p1500_p2 = scmp.lt.s32.totalorder %s1908_s24, %s1498_s7 }
  0x6e   : > { %p1496_p13 = pneg %p1495_p9 }
  0xed   : > { %v579_v4 = vpop.xlane.xlu0 %578 }
  0xee   : > { %v584_v5 = vmul.f32 0.03125, %v579_v4 }
  0xf0   : > { %v586_v6 = vsub.f32 %v574_v0, %v584_v5 }
  0xf1   : > { %v582_v7 = vpop.xlane.xlu0 %581 }
  0xf2   : > { %v585_v8 = vmul.f32 0.03125, %v582_v7  ;;  %v588_v9 = vmul.f32 %v586_v6, %v586_v6 }
  0xf4   : > { %v587_v10 = vsub.f32 %v575_v1, %v585_v8  ;;  %v590_v11 = vsel %vm576_vm0, %v588_v9, 0.0 }
  0xf5   : > { %591 = vadd.xlane.f32.xlu1 %v590_v11 }
  0xf6   : > { %v589_v12 = vmul.f32 %v587_v10, %v587_v10 }
  0xf8   : > { %v593_v13 = vsel %vm576_vm0, %v589_v12, 0.0 }
  0xf9   : > { %594 = vadd.xlane.f32.xlu1 %v593_v13 }
 0x17e   : > { %v592_v19 = vpop.xlane.xlu1 %591 }
 0x17f   : > { %v596_v20 = vmul.f32 0.03125, %v592_v19 }
 0x181   : > { %v598_v21 = vadd.f32 1e-05, %v596_v20 }
 0x182   : > { %v595_v22 = vpop.xlane.xlu1 %594 }
 0x183   : > { %1383 = vrsqrt.f32 %v598_v21  ;;  %v597_v23 = vmul.f32 0.03125, %v595_v22 }
 0x185   : > { %v599_v24 = vadd.f32 1e-05, %v597_v23 }
 0x187   : > { %1385 = vrsqrt.f32 %v599_v24 }
 0x190   : > { %v1384_v25 = vpop.eup %1383 }
 0x191   : > { %v602_v27 = vmul.f32 %v1384_v25, %v586_v6 }
 0x193   : > { %v611_v29 = vmul.f32 %v1186_v26, %v602_v27 }
 0x194   : > { %v1386_v30 = vpop.eup %1385 }
 0x195   : > { %v620_v31 = vadd.f32 %v1187_v28, %v611_v29  ;;  %v603_v32 = vmul.f32 %v1386_v30, %v587_v10 }
 0x197   : > { %v1221_v33 = vpack.c.bf16 %v620_v31, %v620_v31  ;;  %v612_v34 = vmul.f32 %v1186_v26, %v603_v32 }
 0x199   : > { %631 = vst.msk [vmem:[#allocation2] sm:$0xf] %vm630_vm2, %v1221_v33  ;;  %v621_v35 = vadd.f32 %v1187_v28, %v612_v34 }
 0x19b   : > { %v1222_v36 = vpack.c.bf16 %v621_v35, %v621_v35 }
 0x19d   : > { %632 = vst.msk [vmem:[#allocation2 + $0x4] sm:$0xf] %vm630_vm2, %v1222_v36 }
 0x1a4   : > { %v1380_v38 = vld [vmem:[#allocation2] sm:$0xff]  }
 0x1a5   : > { %1246 = vmatmul.mubr.msk.bf16.vlgmr.msra.gmra.mxu0 %vm576_vm0, %v1380_v38  ;;  %1254 = vmatmul.mubr.msk.bf16.vlgmr.msra.gmra.mxu1 %vm576_vm0, %v1380_v38 }
 0x1a6   : > { %1258 = vmatpush3.bf16.msra.mxu0 %v1381_v37  ;;  %1261 = vmatprep.mubr.msk.bf16.mxu0 %vm1648_vm1, %v1647_v16 }
 0x1a7   : > { %1259 = vmatprep.subr.bf16.mxu0 %v1647_v16 }
 0x1aa   : > { %1260 = vmatpush3.bf16.msra.mxu0 %v1382_v39 }
 0x1ad   : > { %1262 = vmatmul.mubr.msk.bf16.vlgmr.msra.gmra.mxu0 %vm576_vm0, %v1380_v38 }
 0x265   : > { %v701_v42 = vpop.f32.mrf.mxu0  ;;  %v778_v43 = vpop.f32.mrf.mxu1 }
 0x266   : > { %v702_v44 = vadd.f32 %v1190_v40, %v701_v42  ;;  %v779_v45 = vadd.f32 %v1197_v41, %v778_v43 }
 0x267   : > { %v1247_v46 = vpop.f32.mrf.mxu0  ;;  %v1255_v47 = vpop.f32.mrf.mxu1 }
 0x268   : > { %v708_v48 = vmul.f32 0.35355338, %v702_v44  ;;  %v1225_v49 = vpack.c.bf16 %v779_v45, %v779_v45 }
 0x269   : > { %v704_v50 = vpop.f32.mrf.mxu0  ;;  %v781_v51 = vpop.f32.mrf.mxu1 }
 0x26a   : > { %v1223_v52 = vpack.c.bf16 %v708_v48, %v708_v48  ;;  %793 = vst.msk [vmem:[%s548_s15] sm:$0xf] %vm630_vm2, %v1225_v49  ;;  %v705_v53 = vadd.f32 %v1190_v40, %v704_v50  ;;  %v782_v54 = vadd.f32 %v1197_v41, %v781_v51 }
 0x26b   : > { %v1248_v55 = vpop.f32.mrf.mxu0  ;;  %v1256_v56 = vpop.f32.mrf.mxu1 }
 0x26c   : > { %719 = vst.msk [vmem:[%s1897_s23] sm:$0xf] %vm630_vm2, %v1223_v52  ;;  %v709_v58 = vmul.f32 0.35355338, %v705_v53  ;;  %v1226_v59 = vpack.c.bf16 %v782_v54, %v782_v54 }
 0x26d   : > { %v852_v60 = vpop.f32.mrf.mxu0 }
 0x26e   : > { %v1224_v61 = vpack.c.bf16 %v709_v58, %v709_v58  ;;  %794 = vst.msk [vmem:[%s548_s15 + $0x4] sm:$0xf] %vm630_vm2, %v1226_v59  ;;  %v853_v62 = vadd.f32 %v1894_v57, %v852_v60  ;;  %s1499_s15 = scalar_lea.vmem %s1498_s7, 256 }
 0x26f   : > { %v1263_v63 = vpop.f32.mrf.mxu0  ;;  %p1501_p4 = scmp.lt.s32.totalorder %s1499_s15, %s1493_s26 }
 0x271   : > { %p1502_p6 = por %p1501_p4, %p1500_p2 }
 0x273   : > { %p1503_p12 = pnand %p1502_p6, %p1496_p13 }
 0x275   : > { %1506 = shalt.err (!%p1503_p12)
}
 0x276   : > { %s1507_s3 = scalar_lea.hbm %s1906_s25, 128  ;;  %s1511_s29 = scalar_lea.hbm %s2050_s10, 256 }
 0x277   : > { %p1508_p0 = scmp.ne.s32.totalorder %s1906_s25, %s1507_s3  ;;  %p1512_p7 = scmp.lt.s32.totalorder %s1906_s25, %s2050_s10 }
 0x278   : > { %p1513_p8 = scmp.lt.s32.totalorder %s1511_s29, %s1507_s3 }
 0x279   : > { %p1509_p3 = pnand %p1508_p0, %p1812_p5 }
 0x27a   : > { %p1514_p11 = por %p1513_p8, %p1512_p7 }
 0x27b   : > { %p1510_p10 = pneg %p1509_p3 }
 0x27d   : > { %p1515_p1 = pnand %p1514_p11, %p1510_p10 }
 0x27f   : > { %1518 = shalt.err (!%p1515_p1)
}
 0x280   : > { %s1650_s26 = smov 64   ;;  %s1651_s7 = smov 4   ;;  %720 = vst.msk [vmem:[%s1897_s23 + $0x4] sm:$0xf] %vm630_vm2, %v1224_v61  ;;  %v1227_v0 = vpack.c.bf16 %v853_v62, %v853_v62  ;;  %v855_v1 = vpop.f32.mrf.mxu0 }
 0x281   : > { %1280 = dma.vmem_to_hbm [thread:$0]  (%p1812_p5), %s1908_s24, 128, %s1906_s25, %s1920_s17, %s1650_s26, %s1650_s26, %s1651_s7  }
 0x282   : > { %s1949_s0 = scalar_lea.vmem [#allocation14], %s1883_s28  ;;  %s870_s3 = scalar_lea.sflag [#allocation5], %s1842_s14 }
 0x283   : > { %s934_s15 = sshll.u32 %s1949_s0, 4  ;;  %s1519_s11 = scalar_lea.vmem %s1918_s20, 128  ;;  %s1981_s15 = int_to_ptr.vmem [resolvable:$true] %s934_s15 }
 0x284   : > { %p1520_p9 = scmp.ne.s32.totalorder %s1918_s20, %s1519_s11  ;;  %s1652_s27 = smov [#allocation11]  }
 0x285   : > { %s1523_s29 = sshll.u32 %s1652_s27, 4  ;;  %s1524_s29 = int_to_ptr.vmem [resolvable:$false] %s1523_s29 }
 0x286   : > { %p1521_p13 = pnand %p1520_p9, %p1812_p5  ;;  %s1525_s5 = scalar_lea.vmem %s1524_s29, 256 }
 0x287   : > { %p1526_p4 = scmp.lt.s32.totalorder %s1918_s20, %s1524_s29  ;;  %p1527_p6 = scmp.lt.s32.totalorder %s1525_s5, %s1519_s11 }
 0x288   : > { %p1522_p2 = pneg %p1521_p13 }
 0x289   : > { %p1528_p12 = por %p1527_p6, %p1526_p4 }
 0x28b   : > { %p1529_p0 = pnand %p1528_p12, %p1522_p2 }
 0x28d   : > { %1532 = shalt.err (!%p1529_p0)
}
 0x28e   : > { %s1533_s28 = scalar_lea.hbm %s1916_s16, 128  ;;  %s1537_s23 = scalar_lea.hbm %s2049_s9, 256 }
 0x28f   : > { %p1534_p3 = scmp.ne.s32.totalorder %s1916_s16, %s1533_s28  ;;  %p1538_p8 = scmp.lt.s32.totalorder %s1916_s16, %s2049_s9 }
 0x290   : > { %p1539_p11 = scmp.lt.s32.totalorder %s1537_s23, %s1533_s28 }
 0x291   : > { %p1535_p10 = pnand %p1534_p3, %p1812_p5 }
 0x292   : > { %p1540_p1 = por %p1539_p11, %p1538_p8 }
 0x293   : > { %p1536_p7 = pneg %p1535_p10 }
 0x295   : > { %p1541_p9 = pnand %p1540_p1, %p1536_p7 }
 0x297   : > { %1544 = shalt.err (!%p1541_p9)
}
 0x298   : > { %1279 = dma.vmem_to_hbm [thread:$0]  (%p1812_p5), %s1918_s20, 128, %s1916_s16, %s870_s3, %s1650_s26, %s1650_s26, %s1651_s7   ;;  %v856_v2 = vadd.f32 %v1894_v57, %v855_v1  ;;  %v1264_v3 = vpop.f32.mrf.mxu0 }
 0x299   : > { %867 = vst.msk [vmem:[%s1949_s0] sm:$0xf] %vm630_vm2, %v1227_v0  ;;  %s2083_s5 = sld [smem:[#allocation27_spill]]  ;;  %s1545_s20 = scalar_lea.vmem %s1981_s15, 128 }
 0x29a   : > { %v1228_v4 = vpack.c.bf16 %v856_v2, %v856_v2  ;;  %p1546_p13 = scmp.ne.s32.totalorder %s1981_s15, %s1545_s20  ;;  %s1653_s16 = smov [#allocation14]  }
 0x29b   : > { %s1549_s3 = sshll.u32 %s1653_s16, 4  ;;  %s1550_s3 = int_to_ptr.vmem [resolvable:$false] %s1549_s3 }
 0x29c   : > { %868 = vst.msk [vmem:[%s1949_s0 + $0x4] sm:$0xf] %vm630_vm2, %v1228_v4  ;;  %p1547_p2 = pnand %p1546_p13, %p1812_p5  ;;  %s1551_s14 = scalar_lea.vmem %s1550_s3, 256 }
 0x29d   : > { %p1552_p6 = scmp.lt.s32.totalorder %s1981_s15, %s1550_s3  ;;  %p1553_p12 = scmp.lt.s32.totalorder %s1551_s14, %s1545_s20 }
 0x29e   : > { %p1548_p4 = pneg %p1547_p2 }
 0x29f   : > { %s1987_s28 = scalar_lea.hbm %s2083_s5, %s1888_s13  ;;  %p1554_p0 = por %p1553_p12, %p1552_p6 }
 0x2a1   : > { %p1555_p3 = pnand %p1554_p0, %p1548_p4 }
 0x2a3   : > { %1558 = shalt.err (!%p1555_p3)
}
 0x2a4   : > { %s1559_s13 = scalar_lea.hbm %s1987_s28, 128  ;;  %s1563_s23 = scalar_lea.hbm %s2083_s5, 256 }
 0x2a5   : > { %p1560_p10 = scmp.ne.s32.totalorder %s1987_s28, %s1559_s13  ;;  %p1564_p11 = scmp.lt.s32.totalorder %s1987_s28, %s2083_s5 }
 0x2a6   : > { %p1565_p1 = scmp.lt.s32.totalorder %s1563_s23, %s1559_s13 }
 0x2a7   : > { %p1561_p7 = pnand %p1560_p10, %p1812_p5 }
 0x2a8   : > { %p1566_p9 = por %p1565_p1, %p1564_p11 }
 0x2a9   : > { %p1562_p8 = pneg %p1561_p7 }
 0x2ab   : > { %p1567_p13 = pnand %p1566_p9, %p1562_p8 }
 0x2ad   : > { %1570 = shalt.err (!%p1567_p13)
}
 0x2ae   : > { %1281 = dma.vmem_to_hbm [thread:$0]  (%p1812_p5), %s1981_s15, 128, %s1987_s28, %s1920_s17, %s1650_s26, %s1650_s26, %s1651_s7  }
 0x2af PF: > { %s2084_s11 = sld [smem:[#allocation20_spill]]  ;;  %p2087_p4 = scmp.ge.s32.totalorder %s1637_s22, 2 }
 0x2b0   : > { %s2085_s29 = sld [smem:[#allocation21_spill]] }
 0x2b5   : > { %s949_s20 = sand.u32 1, %s2084_s11  }
 0x2b6   : > { %p2086_p2 = scmp.ne.s32.totalorder %s2085_s29, 0  ;;  %s950_s16 = scalar_lea.sflag [#allocation5], %s949_s20 }
 0x2b8   : > { %p1300_p6 = pnand %p2087_p4, %p2086_p2 }
 0x2ba   : > { %p1301_p12 = pneg %p1300_p6 }
 0x2bc   : > { %1608 = dma.done.wait (%p1301_p12), %s950_s16, 128  }
 0x2bd   : > { %1610 = vsyncadd (%p1301_p12), %s950_s16, 4294967168  ;;  %s2088_s30 = sadd.s32 4294967294, %s1637_s22  }
 0x2be   : > { %s958_s3 = sand.u32 1, %s2088_s30  }
 0x2bf   : > { %s959_s14 = scalar_lea.sflag [#allocation13], %s958_s3 }
 0x2c0   : > { %1612 = dma.done.wait (%p1301_p12), %s959_s14, 256  }
 0x2c1   : > { %1614 = vsyncadd (%p1301_p12), %s959_s14, 4294967040  ;;  %s33_s22 = sadd.s32 1, %s1637_s22   ;;  %s2089_s26 = sld [smem:[#allocation22_spill]] }
 0x2c2   : > { %p30_p5 = scmp.ge.s32.totalorder %s33_s22, 4   ;;  %s2090_s17 = smov %s1621_s18 }
 0x2c3   : > { %s2091_s18 = smov %s1625_s19  ;;  %s2092_s19 = smov %s1824_s12 }
 0x2c4   : > { %s2093_s20 = smov %s1633_s21  ;;  %32 = sbr.rel (!%p30_p5) target bundleno = 16 (0x10), region = 161 }
 0x2c7   : > { %s2094_s21 = smov %s2089_s26 }
 0x2c9   :  { %973 = vsyncpa [#allocation4], 1 }
 0x2ca   :  { %975 = vsyncpa [#allocation4 + $0x1], 1 }
 0x2cb   :  { %976 = vsyncpa [#allocation7], 1 }
 0x2cc   :  { %977 = vsyncpa [#allocation10], 1 }
 0x2cd   :  { %978 = vsyncpa [#allocation5], 1 }
 0x2ce   :  { %980 = vsyncpa [#allocation5 + $0x1], 1 }
 0x2cf   :  { %981 = vsyncpa [#allocation13], 1 }
 0x2d0   :  { %983 = vsyncpa [#allocation13 + $0x1], 1 }

</bundles_post_ra>
